<compile_context>
chip_gen: v7x
topology: tpu7x:2x2x1
jax: 0.10.0
libtpu: 0.0.40
codegen_flags: <defaults>
</compile_context>

<pallas_src>
import functools

import jax
import jax.numpy as jnp
from jax.experimental import pallas as pl
from jax.experimental.pallas import tpu as pltpu


def _rmsnorm_kernel(x_ref, scale_ref, o_ref, *, eps):
    # x_ref: (block_rows, d) tile; scale_ref: (1, d) resident block.
    x = x_ref[...].astype(jnp.float32)
    scale = scale_ref[...].astype(jnp.float32)            # broadcasts over rows

    ms = jnp.mean(x * x, axis=-1, keepdims=True)          # (tm, 1)
    # eps OUTSIDE the sqrt -- exactly the reference module's formulation.
    # Exact (non-approx) reciprocal: it only touches a (tm, 1) vector, so the
    # per-element work stays a VPU multiply instead of a divide.
    inv = 1.0 / (jnp.sqrt(ms) + eps)                       # (tm, 1)

    o_ref[...] = (x * inv * scale).astype(o_ref.dtype)


def rmsnorm(x, scale, *, eps=1e-6, target_tile_bytes=2 * 1024 * 1024):
    """x: (..., d), scale: (d,). Returns the same shape/dtype as x."""
    orig_shape = x.shape
    d = orig_shape[-1]
    x2 = x.reshape(-1, d)                    # metadata-only for contiguous x
    rows = x2.shape[0]
    scale_row = scale.reshape(1, d)

    itemsize = jnp.dtype(x2.dtype).itemsize
    # Sublane packing: 8 rows (f32), 16 (bf16/f16), 32 (int8/fp8).
    row_mult = 8 * max(1, 4 // itemsize)

    # ~2 MiB tiles: big enough to sit near the HBM roofline, small enough that
    # double-buffered in+out stays under the default scoped VMEM everywhere.
    rows_fit = max(1, target_tile_bytes // max(1, d * itemsize))
    block_rows = max(row_mult, (rows_fit // row_mult) * row_mult)
    # Never use a block larger than one ceil-rounded pass over the rows.
    block_rows = min(block_rows, pl.cdiv(rows, row_mult) * row_mult)
    if rows < block_rows:
        # Full-extent row block (always a legal block shape) -> single tile,
        # no out-of-bounds rows at all for small inputs.
        block_rows = rows

    grid = (pl.cdiv(rows, block_rows),)      # ragged last block handled by Pallas
    kernel = functools.partial(_rmsnorm_kernel, eps=eps)

    out = pl.pallas_call(
        kernel,
        out_shape=jax.ShapeDtypeStruct((rows, d), x.dtype),
        grid_spec=pltpu.PrefetchScalarGridSpec(
            num_scalar_prefetch=0,
            grid=grid,
            in_specs=[
                pl.BlockSpec((block_rows, d), lambda i: (i, 0)),
                pl.BlockSpec((1, d), lambda i: (0, 0)),     # scale stays resident
            ],
            out_specs=pl.BlockSpec((block_rows, d), lambda i: (i, 0)),
        ),
        compiler_params=pltpu.CompilerParams(
            # Single independent row axis: shards across the 2 TCs on v7x.
            dimension_semantics=("parallel",),
        ),
    )(x2, scale_row)

    return out.reshape(orig_shape)


def _ref(x, scale, eps=1e-6):
    return x / (jnp.sqrt(jnp.mean(x ** 2, axis=-1, keepdims=True)) + eps) * scale


if __name__ == "__main__":
    key = jax.random.PRNGKey(0)
    k_x, k_x2, k_s2, k_x3, k_s3 = jax.random.split(key, 5)

    # Shapes implied by the module's forward: (batch, seq, hidden), norm over hidden.
    batch, seq, hidden = 2, 8, 32
    x = jax.random.normal(k_x, (batch, seq, hidden), dtype=jnp.float32)
    scale = jnp.ones((hidden,), dtype=jnp.float32)   # matches nn.Parameter(torch.ones(d))

    y = rmsnorm(x, scale)
    jax.block_until_ready(y)
    assert y.shape == x.shape and y.dtype == x.dtype
    assert jnp.allclose(y, _ref(x, scale), atol=1e-5, rtol=1e-5), "mismatch (d=32 path)"

    # Lane-dense d >= 128 path, non-8-multiple row count, non-trivial scale.
    x_b = jax.random.normal(k_x2, (3, 5, 256), dtype=jnp.float32)
    s_b = jax.random.normal(k_s2, (256,), dtype=jnp.float32)
    y_b = rmsnorm(x_b, s_b)
    jax.block_until_ready(y_b)
    assert jnp.allclose(y_b, _ref(x_b, s_b), atol=1e-5, rtol=1e-5), "mismatch (d=256 path)"

    # Force a ragged (non-divisible) grid with a tiny tile budget: 40 rows,
    # 16-row blocks -> 3 grid steps, last block partially out of bounds.
    x_c = jax.random.normal(k_x3, (40, 128), dtype=jnp.float32)
    s_c = jax.random.normal(k_s3, (128,), dtype=jnp.float32)
    y_c = rmsnorm(x_c, s_c, target_tile_bytes=128 * 4 * 16)
    jax.block_until_ready(y_c)
    assert jnp.allclose(y_c, _ref(x_c, s_c), atol=1e-5, rtol=1e-5), "mismatch (ragged grid)"

    print("KERNEL_OK")
</pallas_src>

<mosaic_0001>
module attributes {stable_mosaic.version = 11 : i64} {
  func.func @_rmsnorm_kernel(%arg0: i32, %arg1: memref<16x32xf32, #tpu.memory_space<vmem>>, %arg2: memref<1x32xf32, #tpu.memory_space<vmem>>, %arg3: memref<16x32xf32, #tpu.memory_space<vmem>>) attributes {dimension_semantics = [#tpu.dimension_semantics<parallel>], iteration_bounds = array<i64: 1>, scalar_prefetch = 0 : i64, scratch_operands = 0 : i64, tpu.core_type = #tpu.core_type<tc>, window_params = [{transform_indices = @transform_0, window_bounds = array<i64: 16, 32>}, {pipeline_mode = #tpu.pipeline_mode<synchronous>, transform_indices = @transform_1, window_bounds = array<i64: 1, 32>}, {transform_indices = @transform_2, window_bounds = array<i64: 16, 32>}]} {
    %c0 = arith.constant 0 : index
    %c0_0 = arith.constant 0 : index
    %0 = vector.load %arg1[%c0, %c0_0] : memref<16x32xf32, #tpu.memory_space<vmem>>, vector<16x32xf32>
    %c0_1 = arith.constant 0 : index
    %c0_2 = arith.constant 0 : index
    %1 = vector.load %arg2[%c0_1, %c0_2] : memref<1x32xf32, #tpu.memory_space<vmem>>, vector<1x32xf32>
    %2 = arith.mulf %0, %0 : vector<16x32xf32>
    %cst = arith.constant dense<0.000000e+00> : vector<16xf32>
    %3 = vector.multi_reduction <add>, %2, %cst [1] : vector<16x32xf32> to vector<16xf32>
    %4 = vector.shape_cast %3 : vector<16xf32> to vector<16x1xf32>
    %cst_3 = arith.constant 3.200000e+01 : f32
    %5 = vector.broadcast %cst_3 : f32 to vector<16x1xf32>
    %6 = arith.divf %4, %5 : vector<16x1xf32>
    %7 = math.sqrt %6 : vector<16x1xf32>
    %cst_4 = arith.constant 9.99999997E-7 : f32
    %8 = vector.broadcast %cst_4 : f32 to vector<16x1xf32>
    %9 = arith.addf %7, %8 : vector<16x1xf32>
    %cst_5 = arith.constant 1.000000e+00 : f32
    %10 = vector.broadcast %cst_5 : f32 to vector<16x1xf32>
    %11 = arith.divf %10, %9 : vector<16x1xf32>
    %12 = vector.broadcast %11 : vector<16x1xf32> to vector<16x32xf32>
    %13 = arith.mulf %0, %12 : vector<16x32xf32>
    %14 = vector.broadcast %1 : vector<1x32xf32> to vector<16x32xf32>
    %15 = arith.mulf %13, %14 : vector<16x32xf32>
    %c0_6 = arith.constant 0 : index
    %c0_7 = arith.constant 0 : index
    %16 = vector.load %arg3[%c0_6, %c0_7] : memref<16x32xf32, #tpu.memory_space<vmem>>, vector<16x32xf32>
    tpu.vector_store %arg3[%c0_6, %c0_7], %15 {strides = array<i32>} : memref<16x32xf32, #tpu.memory_space<vmem>>, vector<16x32xf32>,
    return
  }
  func.func @transform_0(%arg0: i32) -> (i32, i32) {
    %c0_i32 = arith.constant 0 : i32
    %c0_i32_0 = arith.constant 0 : i32
    return %arg0, %c0_i32 : i32, i32
  }
  func.func @transform_1(%arg0: i32) -> (i32, i32) {
    %c0_i32 = arith.constant 0 : i32
    %c0_i32_0 = arith.constant 0 : i32
    %c0_i32_1 = arith.constant 0 : i32
    return %c0_i32, %c0_i32_0 : i32, i32
  }
  func.func @transform_2(%arg0: i32) -> (i32, i32) {
    %c0_i32 = arith.constant 0 : i32
    %c0_i32_0 = arith.constant 0 : i32
    return %arg0, %c0_i32 : i32, i32
  }
}

</mosaic_0001>

<bundles_post_ra>
// kernel: tpu_custom_call.1
= control target key start
LH: loop header
LB: loop body
LE: loop exit
PB: predicated region body
PF: predicated region fallthrough
CT: control target
= control target key end

     0   :  { %7 = vsyncpa [#allocation3], 0  ;;  %s207_s0 = inlined_call_operand.hbm [shape: f32[16,32], index: 0, kind: input, shape index: {}]   ;;  %s208_s1 = inlined_call_operand.vmem [shape: f32[1,32], index: 1, kind: input, shape index: {}]   ;;  %s209_s2 = inlined_call_operand.hbm [shape: f32[16,32], index: 2, kind: output, shape index: {}]  }
   0x1   :  { %8 = vsyncpa [#allocation4], 0  ;;  %s151_s9 = smov [#allocation2]   ;;  %s103_s13 = scalar_lea.hbm %s207_s0, 256 }
   0x2   :  { %s14_s10 = sshll.u32 %s151_s9, 4  ;;  %p104_p0 = scmp.ne.s32.totalorder %s207_s0, %s103_s13  ;;  %s15_s10 = int_to_ptr.vmem [resolvable:$true] %s14_s10 }
   0x3   :  { %p107_p1 = scmp.lt.u32.totalorder %s103_s13, %s207_s0 }
   0x5   :  { %p109_p2 = pnand %p107_p1, %p104_p0 }
   0x7   :  { %112 = shalt.err (!%p109_p2)
}
   0x8   :  { %s113_s18 = scalar_lea.vmem %s15_s10, 256  ;;  %p118_p4 = scmp.lt.s32.totalorder %s15_s10, %s15_s10 }
   0x9   :  { %p114_p3 = scmp.ne.s32.totalorder %s15_s10, %s113_s18  ;;  %p119_p5 = scmp.lt.s32.totalorder %s113_s18, %s113_s18 }
   0xb   :  { %p120_p6 = por %p119_p5, %p118_p4 }
   0xd   :  { %p121_p7 = pnand %p120_p6, %p114_p3 }
   0xf   :  { %124 = shalt.err (!%p121_p7)
}
  0x10   :  { %s152_s19 = smov 128   ;;  %s153_s20 = smov 8  }
  0x11   :  { %20 = dma.hbm_to_vmem [thread:$0]  %s207_s0, 256, %s15_s10, [#allocation3], %s152_s19, %s152_s19, %s153_s20  }
  0x12   :  { %147 = dma.done.wait [#allocation3], 256  }
  0x13   :  { %148 = vsyncadd [#allocation3], 4294967040  ;;  %v26_v0 = vld [vmem:[#allocation2] sm:$0xff]  ;;  %vm31_vm0 = vcmask 261120   ;;  %v27_v1 = vld [vmem:[#allocation2 + $0x8] sm:$0xff]  ;;  %s154_s24 = smov [#allocation5]  }
  0x14   :  { %v29_v2 = vmul.f32 %v26_v0, %v26_v0  ;;  %v30_v3 = vmul.f32 %v27_v1, %v27_v1  ;;  %v90_v23 = vld [vmem:[%s208_s1] ss:$0 sm:$0xff]  ;;  %s78_s25 = sshll.u32 %s154_s24, 4  ;;  %s79_s25 = int_to_ptr.vmem [resolvable:$true] %s78_s25 }
  0x15   :  { %s125_s26 = scalar_lea.vmem %s79_s25, 256  ;;  %p130_p9 = scmp.lt.s32.totalorder %s79_s25, %s79_s25 }
  0x16   :  { %v32_v4 = vsel %vm31_vm0, %v29_v2, 0.0  ;;  %v35_v5 = vsel %vm31_vm0, %v30_v3, 0.0  ;;  %p126_p8 = scmp.ne.s32.totalorder %s79_s25, %s125_s26  ;;  %p131_p10 = scmp.lt.s32.totalorder %s125_s26, %s125_s26 }
  0x17   :  { %33 = vadd.xlane.f32.xlu0 %v32_v4 }
  0x18   :  { %p132_p11 = por %p131_p10, %p130_p9 }
  0x1a   :  { %p133_p12 = pnand %p132_p11, %p126_p8 }
  0x1b   :  { %36 = vadd.xlane.f32.xlu0 %v35_v5 }
  0xa4   :  { %v34_v6 = vpop.xlane.xlu0 %33 }
  0xa5   :  { %v39_v7 = vmul.f32 0.03125, %v34_v6 }
  0xa7   :  { %95 = vrsqrt.f32 %v39_v7  ;;  %vm43_vm1 = vcmp.eq.f32.partialorder %v39_v7, inf  ;;  %v46_v12 = vand.u32 2147483648, %v39_v7  ;;  %vm45_vm2 = vcmp.eq.f32.partialorder %v39_v7, 0.0 }
  0xa8   :  { %v37_v8 = vpop.xlane.xlu0 %36 }
  0xa9   :  { %v40_v9 = vmul.f32 0.03125, %v37_v8 }
  0xab   :  { %97 = vrsqrt.f32 %v40_v9  ;;  %vm50_vm3 = vcmp.eq.f32.partialorder %v40_v9, inf  ;;  %v53_v18 = vand.u32 2147483648, %v40_v9  ;;  %vm52_vm4 = vcmp.eq.f32.partialorder %v40_v9, 0.0 }
  0xb1   :  { %v96_v10 = vpop.eup %95 }
  0xb2   :  { %v42_v11 = vmul.f32 %v96_v10, %v39_v7 }
  0xb4   :  { %v44_v13 = vsel %vm43_vm1, %v39_v7, %v42_v11 }
  0xb5   :  { %v98_v14 = vpop.eup %97  ;;  %v47_v15 = vsel %vm45_vm2, %v46_v12, %v44_v13 }
  0xb6   :  { %v55_v16 = vadd.f32 1e-06, %v47_v15  ;;  %v49_v17 = vmul.f32 %v98_v14, %v40_v9 }
  0xb8   :  { %v51_v19 = vsel %vm50_vm3, %v40_v9, %v49_v17  ;;  %99 = vrcp.f32 %v55_v16 }
  0xb9   :  { %v54_v20 = vsel %vm52_vm4, %v53_v18, %v51_v19 }
  0xba   :  { %v56_v21 = vadd.f32 1e-06, %v54_v20 }
  0xbc   :  { %101 = vrcp.f32 %v56_v21 }
  0xc2   :  { %v100_v22 = vpop.eup %99 }
  0xc3   :  { %v61_v24 = vmul.f32 %v100_v22, %v26_v0 }
  0xc5   :  { %v69_v25 = vmul.f32 %v90_v23, %v61_v24 }
  0xc6   :  { %v102_v26 = vpop.eup %101 }
  0xc7   :  { %v62_v27 = vmul.f32 %v102_v26, %v27_v1  ;;  %71 = vst.msk [vmem:[#allocation5] sm:$0xff] %vm31_vm0, %v69_v25 }
  0xc9   :  { %v70_v28 = vmul.f32 %v90_v23, %v62_v27 }
  0xcb   :  { %72 = vst.msk [vmem:[#allocation5 + $0x8] sm:$0xff] %vm31_vm0, %v70_v28 }
  0xcc   :  { %136 = shalt.err (!%p133_p12)
}
  0xcd   :  { %s137_s28 = scalar_lea.hbm %s209_s2, 256 }
  0xce   :  { %p138_p13 = scmp.ne.s32.totalorder %s209_s2, %s137_s28  ;;  %p141_p0 = scmp.lt.u32.totalorder %s137_s28, %s209_s2 }
  0xd0   :  { %p143_p1 = pnand %p141_p0, %p138_p13 }
  0xd2   :  { %146 = shalt.err (!%p143_p1)
}
  0xd3   :  { %84 = dma.vmem_to_hbm [thread:$0]  %s79_s25, 256, %s209_s2, [#allocation4], %s152_s19, %s152_s19, %s153_s20  }
  0xd4   :  { %149 = dma.done.wait [#allocation4], 256  }
  0xd5   :  { %150 = vsyncadd [#allocation4], 4294967040 }
  0xd6   :  { %88 = vsyncpa [#allocation3], 1 }
  0xd7   :  { %89 = vsyncpa [#allocation4], 1 }

</bundles_post_ra>
